<compile_context>
chip_gen: v5e
topology: v5e:2x2
jax: 0.10.0
libtpu: 0.0.40
codegen_flags: <defaults>
</compile_context>

<pallas_src>
import jax
import jax.numpy as jnp
import numpy as np
from jax.experimental import pallas as pl
from jax.experimental.pallas import tpu as pltpu


def critic_kernel(s_ref, a_ref,
                  w1s_ref, w1a_ref, b14_ref,
                  w2_ref, b2_ref, w5_ref, b5_ref,
                  w3p_ref, w6p_ref, b36_ref,
                  q12_ref):
    hid = w2_ref.shape[0]            # 256
    s = s_ref[...]
    a = a_ref[...]

    # ---- fused layer 1 (both heads), in-kernel "concat" via split-K matmul ----
    h_all = (jnp.dot(s, w1s_ref[...], preferred_element_type=jnp.float32)
             + jnp.dot(a, w1a_ref[...], preferred_element_type=jnp.float32)
             + b14_ref[...])
    h_all = jnp.maximum(h_all, 0.0)                 # (TB, 512)
    h = h_all[:, :hid]                              # Q1 hidden
    g = h_all[:, hid:]                              # Q2 hidden

    # ---- layer 2, per head ----
    h = jnp.maximum(
        jnp.dot(h, w2_ref[...], preferred_element_type=jnp.float32) + b2_ref[...], 0.0)
    g = jnp.maximum(
        jnp.dot(g, w5_ref[...], preferred_element_type=jnp.float32) + b5_ref[...], 0.0)

    # ---- fused output layer: single lane-dense (TB, 2) store ----
    q12 = (jnp.dot(h, w3p_ref[...], preferred_element_type=jnp.float32)
           + jnp.dot(g, w6p_ref[...], preferred_element_type=jnp.float32)
           + b36_ref[...])
    q12_ref[...] = q12


def critic_forward(state, action, params, tile_b=1024):
    """state: (B, state_dim), action: (B, action_dim). Returns (q1, q2), each (B, 1)."""
    B, state_dim = state.shape
    action_dim = action.shape[1]
    (w1, b1, w2, b2, w3, b3, w4, b4, w5, b5, w6, b6) = params
    hid = w2.shape[0]

    # ---- weight fusion (batch-independent, tiny; const-folds under jit) ----
    w1s = jnp.concatenate([w1[:state_dim], w4[:state_dim]], axis=1)   # (sd, 2H)
    w1a = jnp.concatenate([w1[state_dim:], w4[state_dim:]], axis=1)   # (ad, 2H)
    b14 = jnp.concatenate([b1, b4], axis=1)                           # (1, 2H)
    w3p = jnp.concatenate([w3, jnp.zeros_like(w3)], axis=1)           # (H, 2) = [w3 | 0]
    w6p = jnp.concatenate([jnp.zeros_like(w6), w6], axis=1)           # (H, 2) = [0 | w6]
    b36 = jnp.concatenate([b3, b6], axis=1)                           # (1, 2)

    # ---- batch tiling ----
    tb = int(min(tile_b, B))
    assert tb == B or tb % 8 == 0, "tile_b must be a multiple of 8 (sublane) when tiling"
    if B % tb != 0:
        pad = (-B) % tb
        state = jnp.pad(state, ((0, pad), (0, 0)))
        action = jnp.pad(action, ((0, pad), (0, 0)))
    Bp = state.shape[0]
    grid = (Bp // tb,)

    const = lambda shape: pl.BlockSpec(shape, lambda i: (0, 0))       # VMEM-resident
    in_specs = [
        pl.BlockSpec((tb, state_dim), lambda i: (i, 0)),              # streamed
        pl.BlockSpec((tb, action_dim), lambda i: (i, 0)),             # streamed
        const(w1s.shape), const(w1a.shape), const(b14.shape),
        const(w2.shape), const(b2.shape), const(w5.shape), const(b5.shape),
        const(w3p.shape), const(w6p.shape), const(b36.shape),
    ]
    out_specs = pl.BlockSpec((tb, 2), lambda i: (i, 0))

    sa_dim = state_dim + action_dim
    flops = 2 * Bp * (sa_dim * 2 * hid + 2 * hid * hid + 2 * hid * 2)
    weight_bytes = 4 * (sa_dim * 2 * hid + 2 * hid + 2 * hid * hid + 2 * hid
                        + 4 * hid + 2)
    bytes_accessed = weight_bytes + 4 * Bp * (sa_dim + 2)

    q12 = pl.pallas_call(
        critic_kernel,
        out_shape=jax.ShapeDtypeStruct((Bp, 2), jnp.float32),
        grid=grid,
        in_specs=in_specs,
        out_specs=out_specs,
        compiler_params=pltpu.CompilerParams(
            dimension_semantics=("parallel",)),
        cost_estimate=pl.CostEstimate(
            flops=flops, transcendentals=0, bytes_accessed=bytes_accessed),
    )(state, action, w1s, w1a, b14, w2, b2, w5, b5, w3p, w6p, b36)

    q1 = q12[:B, 0:1]
    q2 = q12[:B, 1:2]
    return q1, q2


def init_linear_params(key, in_dim, out_dim):
    """PyTorch-style init U(-1/sqrt(fan_in), 1/sqrt(fan_in)); weight in (in, out)."""
    kw, kb = jax.random.split(key)
    bound = 1.0 / np.sqrt(in_dim)
    w = jax.random.uniform(kw, (in_dim, out_dim), jnp.float32, -bound, bound)
    b = jax.random.uniform(kb, (1, out_dim), jnp.float32, -bound, bound)
    return w, b


def init_critic_params(key, state_dim, action_dim):
    sa_dim = state_dim + action_dim
    keys = jax.random.split(key, 6)
    w1, b1 = init_linear_params(keys[0], sa_dim, 256)
    w2, b2 = init_linear_params(keys[1], 256, 256)
    w3, b3 = init_linear_params(keys[2], 256, 1)
    w4, b4 = init_linear_params(keys[3], sa_dim, 256)
    w5, b5 = init_linear_params(keys[4], 256, 256)
    w6, b6 = init_linear_params(keys[5], 256, 1)
    return (w1, b1, w2, b2, w3, b3, w4, b4, w5, b5, w6, b6)


def critic_reference(state, action, params):
    """Pure-JAX reference mirroring the PyTorch forward."""
    (w1, b1, w2, b2, w3, b3, w4, b4, w5, b5, w6, b6) = params
    sa = jnp.concatenate([state, action], axis=1)
    q1 = jax.nn.relu(sa @ w1 + b1)
    q1 = jax.nn.relu(q1 @ w2 + b2)
    q1 = q1 @ w3 + b3
    q2 = jax.nn.relu(sa @ w4 + b4)
    q2 = jax.nn.relu(q2 @ w5 + b5)
    q2 = q2 @ w6 + b6
    return q1, q2


if __name__ == "__main__":
    key = jax.random.PRNGKey(0)
    k_params, k_state, k_action = jax.random.split(key, 3)

    state_dim, action_dim = 12, 4
    params = init_critic_params(k_params, state_dim, action_dim)

    # Case 1: tiny batch, single tile (grid=1).
    batch = 8
    state = jax.random.normal(k_state, (batch, state_dim), jnp.float32)
    action = jax.random.normal(k_action, (batch, action_dim), jnp.float32)
    q1, q2 = critic_forward(state, action, params)
    q1 = jax.block_until_ready(q1)
    q2 = jax.block_until_ready(q2)
    q1_ref, q2_ref = critic_reference(state, action, params)
    np.testing.assert_allclose(np.asarray(q1), np.asarray(q1_ref), rtol=1e-5, atol=1e-5)
    np.testing.assert_allclose(np.asarray(q2), np.asarray(q2_ref), rtol=1e-5, atol=1e-5)

    # Case 2: exercise the batch-tiled pipelined path (grid=3, tile_b=8).
    batch2 = 24
    ks2, ka2 = jax.random.split(jax.random.PRNGKey(1))
    state2 = jax.random.normal(ks2, (batch2, state_dim), jnp.float32)
    action2 = jax.random.normal(ka2, (batch2, action_dim), jnp.float32)
    q1b, q2b = critic_forward(state2, action2, params, tile_b=8)
    q1b = jax.block_until_ready(q1b)
    q2b = jax.block_until_ready(q2b)
    q1b_ref, q2b_ref = critic_reference(state2, action2, params)
    np.testing.assert_allclose(np.asarray(q1b), np.asarray(q1b_ref), rtol=1e-5, atol=1e-5)
    np.testing.assert_allclose(np.asarray(q2b), np.asarray(q2b_ref), rtol=1e-5, atol=1e-5)

    print("KERNEL_OK")
</pallas_src>

<mosaic_0001>
module attributes {stable_mosaic.version = 11 : i64} {
  func.func @critic_kernel(%arg0: i32, %arg1: memref<8x12xf32, #tpu.memory_space<vmem>>, %arg2: memref<8x4xf32, #tpu.memory_space<vmem>>, %arg3: memref<12x512xf32, #tpu.memory_space<vmem>>, %arg4: memref<4x512xf32, #tpu.memory_space<vmem>>, %arg5: memref<1x512xf32, #tpu.memory_space<vmem>>, %arg6: memref<256x256xf32, #tpu.memory_space<vmem>>, %arg7: memref<1x256xf32, #tpu.memory_space<vmem>>, %arg8: memref<256x256xf32, #tpu.memory_space<vmem>>, %arg9: memref<1x256xf32, #tpu.memory_space<vmem>>, %arg10: memref<256x2xf32, #tpu.memory_space<vmem>>, %arg11: memref<256x2xf32, #tpu.memory_space<vmem>>, %arg12: memref<1x2xf32, #tpu.memory_space<vmem>>, %arg13: memref<8x2xf32, #tpu.memory_space<vmem>>) attributes {dimension_semantics = [#tpu.dimension_semantics<parallel>], iteration_bounds = array<i64: 1>, scalar_prefetch = 0 : i64, scratch_operands = 0 : i64, tpu.core_type = #tpu.core_type<tc>, window_params = [{transform_indices = @transform_0, window_bounds = array<i64: 8, 12>}, {transform_indices = @transform_1, window_bounds = array<i64: 8, 4>}, {pipeline_mode = #tpu.pipeline_mode<synchronous>, transform_indices = @transform_2, window_bounds = array<i64: 12, 512>}, {pipeline_mode = #tpu.pipeline_mode<synchronous>, transform_indices = @transform_3, window_bounds = array<i64: 4, 512>}, {pipeline_mode = #tpu.pipeline_mode<synchronous>, transform_indices = @transform_4, window_bounds = array<i64: 1, 512>}, {pipeline_mode = #tpu.pipeline_mode<synchronous>, transform_indices = @transform_5, window_bounds = array<i64: 256, 256>}, {pipeline_mode = #tpu.pipeline_mode<synchronous>, transform_indices = @transform_6, window_bounds = array<i64: 1, 256>}, {pipeline_mode = #tpu.pipeline_mode<synchronous>, transform_indices = @transform_7, window_bounds = array<i64: 256, 256>}, {pipeline_mode = #tpu.pipeline_mode<synchronous>, transform_indices = @transform_8, window_bounds = array<i64: 1, 256>}, {pipeline_mode = #tpu.pipeline_mode<synchronous>, transform_indices = @transform_9, window_bounds = array<i64: 256, 2>}, {pipeline_mode = #tpu.pipeline_mode<synchronous>, transform_indices = @transform_10, window_bounds = array<i64: 256, 2>}, {pipeline_mode = #tpu.pipeline_mode<synchronous>, transform_indices = @transform_11, window_bounds = array<i64: 1, 2>}, {transform_indices = @transform_12, window_bounds = array<i64: 8, 2>}]} {
    %c0 = arith.constant 0 : index
    %c0_0 = arith.constant 0 : index
    %0 = vector.load %arg1[%c0, %c0_0] : memref<8x12xf32, #tpu.memory_space<vmem>>, vector<8x12xf32>
    %c0_1 = arith.constant 0 : index
    %c0_2 = arith.constant 0 : index
    %1 = vector.load %arg2[%c0_1, %c0_2] : memref<8x4xf32, #tpu.memory_space<vmem>>, vector<8x4xf32>
    %c0_3 = arith.constant 0 : index
    %c0_4 = arith.constant 0 : index
    %2 = vector.load %arg3[%c0_3, %c0_4] : memref<12x512xf32, #tpu.memory_space<vmem>>, vector<12x512xf32>
    %cst = arith.constant dense<0.000000e+00> : vector<8x512xf32>
    %3 = tpu.matmul %0, %2, %cst {dimension_numbers = #tpu.dot_dimension_numbers<[1], [0], [0], [1], [0, 0, 1, 1], [], []>} : vector<8x12xf32>, vector<12x512xf32>, vector<8x512xf32> -> vector<8x512xf32>
    %c0_5 = arith.constant 0 : index
    %c0_6 = arith.constant 0 : index
    %4 = vector.load %arg4[%c0_5, %c0_6] : memref<4x512xf32, #tpu.memory_space<vmem>>, vector<4x512xf32>
    %cst_7 = arith.constant dense<0.000000e+00> : vector<8x512xf32>
    %5 = tpu.matmul %1, %4, %cst_7 {dimension_numbers = #tpu.dot_dimension_numbers<[1], [0], [0], [1], [0, 0, 1, 1], [], []>} : vector<8x4xf32>, vector<4x512xf32>, vector<8x512xf32> -> vector<8x512xf32>
    %6 = arith.addf %3, %5 : vector<8x512xf32>
    %c0_8 = arith.constant 0 : index
    %c0_9 = arith.constant 0 : index
    %7 = vector.load %arg5[%c0_8, %c0_9] : memref<1x512xf32, #tpu.memory_space<vmem>>, vector<1x512xf32>
    %8 = vector.broadcast %7 : vector<1x512xf32> to vector<8x512xf32>
    %9 = arith.addf %6, %8 : vector<8x512xf32>
    %cst_10 = arith.constant 0.000000e+00 : f32
    %10 = vector.broadcast %cst_10 : f32 to vector<8x512xf32>
    %11 = arith.maximumf %9, %10 : vector<8x512xf32>
    %12 = vector.extract_strided_slice %11 {offsets = [0, 0], sizes = [8, 256], strides = [1, 1]} : vector<8x512xf32> to vector<8x256xf32>
    %13 = vector.extract_strided_slice %11 {offsets = [0, 256], sizes = [8, 256], strides = [1, 1]} : vector<8x512xf32> to vector<8x256xf32>
    %c0_11 = arith.constant 0 : index
    %c0_12 = arith.constant 0 : index
    %14 = vector.load %arg6[%c0_11, %c0_12] : memref<256x256xf32, #tpu.memory_space<vmem>>, vector<256x256xf32>
    %cst_13 = arith.constant dense<0.000000e+00> : vector<8x256xf32>
    %15 = tpu.matmul %12, %14, %cst_13 {dimension_numbers = #tpu.dot_dimension_numbers<[1], [0], [0], [1], [0, 0, 1, 1], [], []>} : vector<8x256xf32>, vector<256x256xf32>, vector<8x256xf32> -> vector<8x256xf32>
    %c0_14 = arith.constant 0 : index
    %c0_15 = arith.constant 0 : index
    %16 = vector.load %arg7[%c0_14, %c0_15] : memref<1x256xf32, #tpu.memory_space<vmem>>, vector<1x256xf32>
    %17 = vector.broadcast %16 : vector<1x256xf32> to vector<8x256xf32>
    %18 = arith.addf %15, %17 : vector<8x256xf32>
    %cst_16 = arith.constant 0.000000e+00 : f32
    %19 = vector.broadcast %cst_16 : f32 to vector<8x256xf32>
    %20 = arith.maximumf %18, %19 : vector<8x256xf32>
    %c0_17 = arith.constant 0 : index
    %c0_18 = arith.constant 0 : index
    %21 = vector.load %arg8[%c0_17, %c0_18] : memref<256x256xf32, #tpu.memory_space<vmem>>, vector<256x256xf32>
    %cst_19 = arith.constant dense<0.000000e+00> : vector<8x256xf32>
    %22 = tpu.matmul %13, %21, %cst_19 {dimension_numbers = #tpu.dot_dimension_numbers<[1], [0], [0], [1], [0, 0, 1, 1], [], []>} : vector<8x256xf32>, vector<256x256xf32>, vector<8x256xf32> -> vector<8x256xf32>
    %c0_20 = arith.constant 0 : index
    %c0_21 = arith.constant 0 : index
    %23 = vector.load %arg9[%c0_20, %c0_21] : memref<1x256xf32, #tpu.memory_space<vmem>>, vector<1x256xf32>
    %24 = vector.broadcast %23 : vector<1x256xf32> to vector<8x256xf32>
    %25 = arith.addf %22, %24 : vector<8x256xf32>
    %cst_22 = arith.constant 0.000000e+00 : f32
    %26 = vector.broadcast %cst_22 : f32 to vector<8x256xf32>
    %27 = arith.maximumf %25, %26 : vector<8x256xf32>
    %c0_23 = arith.constant 0 : index
    %c0_24 = arith.constant 0 : index
    %28 = vector.load %arg10[%c0_23, %c0_24] : memref<256x2xf32, #tpu.memory_space<vmem>>, vector<256x2xf32>
    %cst_25 = arith.constant dense<0.000000e+00> : vector<8x2xf32>
    %29 = tpu.matmul %20, %28, %cst_25 {dimension_numbers = #tpu.dot_dimension_numbers<[1], [0], [0], [1], [0, 0, 1, 1], [], []>} : vector<8x256xf32>, vector<256x2xf32>, vector<8x2xf32> -> vector<8x2xf32>
    %c0_26 = arith.constant 0 : index
    %c0_27 = arith.constant 0 : index
    %30 = vector.load %arg11[%c0_26, %c0_27] : memref<256x2xf32, #tpu.memory_space<vmem>>, vector<256x2xf32>
    %cst_28 = arith.constant dense<0.000000e+00> : vector<8x2xf32>
    %31 = tpu.matmul %27, %30, %cst_28 {dimension_numbers = #tpu.dot_dimension_numbers<[1], [0], [0], [1], [0, 0, 1, 1], [], []>} : vector<8x256xf32>, vector<256x2xf32>, vector<8x2xf32> -> vector<8x2xf32>
    %32 = arith.addf %29, %31 : vector<8x2xf32>
    %c0_29 = arith.constant 0 : index
    %c0_30 = arith.constant 0 : index
    %33 = vector.load %arg12[%c0_29, %c0_30] : memref<1x2xf32, #tpu.memory_space<vmem>>, vector<1x2xf32>
    %34 = vector.broadcast %33 : vector<1x2xf32> to vector<8x2xf32>
    %35 = arith.addf %32, %34 : vector<8x2xf32>
    %c0_31 = arith.constant 0 : index
    %c0_32 = arith.constant 0 : index
    %36 = vector.load %arg13[%c0_31, %c0_32] : memref<8x2xf32, #tpu.memory_space<vmem>>, vector<8x2xf32>
    tpu.vector_store %arg13[%c0_31, %c0_32], %35 {strides = array<i32>} : memref<8x2xf32, #tpu.memory_space<vmem>>, vector<8x2xf32>,
    return
  }
  func.func @transform_0(%arg0: i32) -> (i32, i32) {
    %c0_i32 = arith.constant 0 : i32
    %c0_i32_0 = arith.constant 0 : i32
    return %arg0, %c0_i32 : i32, i32
  }
  func.func @transform_1(%arg0: i32) -> (i32, i32) {
    %c0_i32 = arith.constant 0 : i32
    %c0_i32_0 = arith.constant 0 : i32
    return %arg0, %c0_i32 : i32, i32
  }
  func.func @transform_2(%arg0: i32) -> (i32, i32) {
    %c0_i32 = arith.constant 0 : i32
    %c0_i32_0 = arith.constant 0 : i32
    %c0_i32_1 = arith.constant 0 : i32
    return %c0_i32, %c0_i32_0 : i32, i32
  }
  func.func @transform_3(%arg0: i32) -> (i32, i32) {
    %c0_i32 = arith.constant 0 : i32
    %c0_i32_0 = arith.constant 0 : i32
    %c0_i32_1 = arith.constant 0 : i32
    return %c0_i32, %c0_i32_0 : i32, i32
  }
  func.func @transform_4(%arg0: i32) -> (i32, i32) {
    %c0_i32 = arith.constant 0 : i32
    %c0_i32_0 = arith.constant 0 : i32
    %c0_i32_1 = arith.constant 0 : i32
    return %c0_i32, %c0_i32_0 : i32, i32
  }
  func.func @transform_5(%arg0: i32) -> (i32, i32) {
    %c0_i32 = arith.constant 0 : i32
    %c0_i32_0 = arith.constant 0 : i32
    %c0_i32_1 = arith.constant 0 : i32
    return %c0_i32, %c0_i32_0 : i32, i32
  }
  func.func @transform_6(%arg0: i32) -> (i32, i32) {
    %c0_i32 = arith.constant 0 : i32
    %c0_i32_0 = arith.constant 0 : i32
    %c0_i32_1 = arith.constant 0 : i32
    return %c0_i32, %c0_i32_0 : i32, i32
  }
  func.func @transform_7(%arg0: i32) -> (i32, i32) {
    %c0_i32 = arith.constant 0 : i32
    %c0_i32_0 = arith.constant 0 : i32
    %c0_i32_1 = arith.constant 0 : i32
    return %c0_i32, %c0_i32_0 : i32, i32
  }
  func.func @transform_8(%arg0: i32) -> (i32, i32) {
    %c0_i32 = arith.constant 0 : i32
    %c0_i32_0 = arith.constant 0 : i32
    %c0_i32_1 = arith.constant 0 : i32
    return %c0_i32, %c0_i32_0 : i32, i32
  }
  func.func @transform_9(%arg0: i32) -> (i32, i32) {
    %c0_i32 = arith.constant 0 : i32
    %c0_i32_0 = arith.constant 0 : i32
    %c0_i32_1 = arith.constant 0 : i32
    return %c0_i32, %c0_i32_0 : i32, i32
  }
  func.func @transform_10(%arg0: i32) -> (i32, i32) {
    %c0_i32 = arith.constant 0 : i32
    %c0_i32_0 = arith.constant 0 : i32
    %c0_i32_1 = arith.constant 0 : i32
    return %c0_i32, %c0_i32_0 : i32, i32
  }
  func.func @transform_11(%arg0: i32) -> (i32, i32) {
    %c0_i32 = arith.constant 0 : i32
    %c0_i32_0 = arith.constant 0 : i32
    %c0_i32_1 = arith.constant 0 : i32
    return %c0_i32, %c0_i32_0 : i32, i32
  }
  func.func @transform_12(%arg0: i32) -> (i32, i32) {
    %c0_i32 = arith.constant 0 : i32
    %c0_i32_0 = arith.constant 0 : i32
    return %arg0, %c0_i32 : i32, i32
  }
}

</mosaic_0001>

<bundles_post_ra>
// kernel: tpu_custom_call.1
= control target key start
LH: loop header
LB: loop body
LE: loop exit
PB: predicated region body
PF: predicated region fallthrough
CT: control target
= control target key end

     0   :  { %17 = vsyncpa [#allocation3], 0  ;;  %s1501_s0 = inlined_call_operand.vmem [shape: f32[8,12], index: 0, kind: input, shape index: {}]   ;;  %s1502_s1 = inlined_call_operand.vmem [shape: f32[8,4], index: 1, kind: input, shape index: {}]   ;;  %s1503_s2 = inlined_call_operand.hbm [shape: f32[12,512], index: 2, kind: input, shape index: {}]   ;;  %s1504_s3 = inlined_call_operand.vmem [shape: f32[4,512], index: 3, kind: input, shape index: {}]   ;;  %s1505_s4 = inlined_call_operand.hbm [shape: f32[1,512], index: 4, kind: input, shape index: {}]   ;;  %s1506_s5 = inlined_call_operand.vmem [shape: f32[256,256], index: 5, kind: input, shape index: {}]   ;;  %s1507_s6 = inlined_call_operand.hbm [shape: f32[1,256], index: 6, kind: input, shape index: {}]   ;;  %s1508_s7 = inlined_call_operand.hbm [shape: f32[256,256], index: 7, kind: input, shape index: {}]   ;;  %s1509_s8 = inlined_call_operand.hbm [shape: f32[1,256], index: 8, kind: input, shape index: {}]   ;;  %s1510_s9 = inlined_call_operand.vmem [shape: f32[256,2], index: 9, kind: input, shape index: {}]   ;;  %s1511_s10 = inlined_call_operand.vmem [shape: f32[256,2], index: 10, kind: input, shape index: {}]   ;;  %s1512_s11 = inlined_call_operand.hbm [shape: f32[1,2], index: 11, kind: input, shape index: {}]   ;;  %s1513_s12 = inlined_call_operand.vmem [shape: f32[8,2], index: 12, kind: output, shape index: {}]  }
   0x1   :  { %18 = vsyncpa [#allocation5], 0 }
   0x2   :  { %19 = vsyncpa [#allocation8], 0  ;;  %s45_s23 = sshll.u32 %s1505_s4, 4  ;;  %s46_s23 = int_to_ptr.hbm [resolvable:$true] %s45_s23 }
   0x3   :  { %20 = vsyncpa [#allocation11], 0  ;;  %s997_s24 = smov [#allocation4]   ;;  %s68_s28 = sshll.u32 %s1508_s7, 4  ;;  %s69_s28 = int_to_ptr.hbm [resolvable:$true] %s68_s28 }
   0x4   :  { %s47_s25 = sshll.u32 %s997_s24, 4  ;;  %s998_s29 = smov [#allocation7]   ;;  %s48_s25 = int_to_ptr.vmem [resolvable:$true] %s47_s25 }
   0x5   :  { %50 = dma.hbm_to_vmem [thread:$0]  %s46_s23, 64, %s48_s25, [#allocation5]  }
   0x6   :  { %s70_s30 = sshll.u32 %s998_s29, 4  ;;  %s999_s13 = smov 256   ;;  %s71_s30 = int_to_ptr.vmem [resolvable:$true] %s70_s30 }
   0x7   :  { %s1000_s14 = smov 16   ;;  %s29_s4 = sshll.u32 %s1503_s2, 4  ;;  %s30_s4 = int_to_ptr.hbm [resolvable:$true] %s29_s4 }
   0x8   :  { %76 = dma.hbm_to_vmem [thread:$0]  %s69_s28, 8192, %s71_s30, [#allocation8], %s999_s13, %s999_s13, %s1000_s14  }
   0x9   :  { %s1001_s17 = smov [#allocation2]   ;;  %s58_s7 = sshll.u32 %s1507_s6, 4  ;;  %s59_s7 = int_to_ptr.hbm [resolvable:$true] %s58_s7 }
   0xa   :  { %s31_s18 = sshll.u32 %s1001_s17, 4  ;;  %s1002_s21 = smov 512   ;;  %s32_s18 = int_to_ptr.vmem [resolvable:$true] %s31_s18 }
   0xb   :  { %s1003_s22 = smov 32   ;;  %s1004_s23 = smov [#allocation6]  }
   0xc   :  { %37 = dma.hbm_to_vmem [thread:$0]  %s30_s4, 1024, %s32_s18, [#allocation3], %s1002_s21, %s1002_s21, %s1003_s22  }
   0xd   :  { %s60_s24 = sshll.u32 %s1004_s23, 4  ;;  %s82_s27 = sshll.u32 %s1509_s8, 4  ;;  %s61_s24 = int_to_ptr.vmem [resolvable:$true] %s60_s24  ;;  %s83_s27 = int_to_ptr.hbm [resolvable:$true] %s82_s27 }
   0xe   :  { %63 = dma.hbm_to_vmem [thread:$0]  %s59_s7, 32, %s61_s24, [#allocation5]  }
   0xf   :  { %s97_s29 = sshll.u32 %s1512_s11, 4  ;;  %s1005_s30 = smov [#allocation9]   ;;  %s98_s29 = int_to_ptr.hbm [resolvable:$true] %s97_s29 }
  0x10   :  { %s84_s13 = sshll.u32 %s1005_s30, 4  ;;  %s1006_s6 = smov [#allocation10]   ;;  %s85_s13 = int_to_ptr.vmem [resolvable:$true] %s84_s13 }
  0x11   :  { %87 = dma.hbm_to_vmem [thread:$0]  %s83_s27, 32, %s85_s13, [#allocation8]  }
  0x12   :  { %s99_s14 = sshll.u32 %s1006_s6, 4  ;;  %s100_s14 = int_to_ptr.vmem [resolvable:$true] %s99_s14 }
  0x13   :  { %102 = dma.hbm_to_vmem [thread:$0]  %s98_s29, 16, %s100_s14, [#allocation11]  }
  0x14   :  { %989 = dma.done.wait [#allocation3], 1024  }
  0x15   :  { %990 = vsyncadd [#allocation3], 4294966272 }
  0x16   :  { %991 = dma.done.wait [#allocation5], 96  }
  0x17   :  { %992 = vsyncadd [#allocation5], 4294967200 }
  0x18   :  { %993 = dma.done.wait [#allocation8], 8224  }
  0x19   :  { %994 = vsyncadd [#allocation8], 4294959072 }
  0x1a   :  { %995 = dma.done.wait [#allocation11], 16  }
  0x1b   :  { %996 = vsyncadd [#allocation11], 4294967280  ;;  %v137_v0 = vld [vmem:[%s1504_s3] sm:$0xff]  ;;  %v138_v1 = vld [vmem:[%s1504_s3 + $0x8] sm:$0xff]  ;;  %vm152_vm0 = vcmask 1043456   ;;  %vm148_vm1 = vcmask 31744  }
  0x1c   :  { %141 = vst [vmem:[#allocation1] ss:$2 sm:$0xff] %v137_v0  ;;  %v128_v2 = vld [vmem:[%s1502_s1] sm:$0xff]  ;;  %v133_v7 = vld [vmem:[#allocation2 + $0x20] sm:$0xf]  ;;  %v130_v12 = vld [vmem:[#allocation2 + $0x8] sm:$0xff] }
  0x1d   :  { %143 = vst [vmem:[#allocation1 + $0x10] ss:$2 sm:$0xff] %v138_v1  ;;  %v134_v8 = vld [vmem:[#allocation2 + $0x28] sm:$0xf]  ;;  %v135_v9 = vld [vmem:[#allocation2 + $0x30] sm:$0xf] }
  0x1e   :  { %v136_v10 = vld [vmem:[#allocation2 + $0x38] sm:$0xf]  ;;  %v129_v11 = vld [vmem:[#allocation2] sm:$0xff]  ;;  %v131_v13 = vld [vmem:[#allocation2 + $0x10] sm:$0xff]  ;;  %vm241_vm2 = vcmask 97280   ;;  %vm808_vm3 = vcmask 15360  }
  0x1f   :  { %v132_v14 = vld [vmem:[#allocation2 + $0x18] sm:$0xff]  ;;  %v385_v15 = vld [vmem:[%s1506_s5 + $0xf0] sm:$0xff]  ;;  %v386_v17 = vld [vmem:[%s1506_s5 + $0xf8] sm:$0xff] }
  0x20   :  { %v417_v16 = vld [vmem:[%s1506_s5 + $0x1f0] sm:$0xff]  ;;  %v418_v18 = vld [vmem:[%s1506_s5 + $0x1f8] sm:$0xff]  ;;  %v127_v19 = vld [vmem:[%s1501_s0] sm:$0xff] }
  0x21   :  { %v383_v20 = vld [vmem:[%s1506_s5 + $0xe0] sm:$0xff]  ;;  %v384_v22 = vld [vmem:[%s1506_s5 + $0xe8] sm:$0xff]  ;;  %v381_v24 = vld [vmem:[%s1506_s5 + $0xd0] sm:$0xff] }
  0x22   :  { %v415_v21 = vld [vmem:[%s1506_s5 + $0x1e0] sm:$0xff]  ;;  %v416_v23 = vld [vmem:[%s1506_s5 + $0x1e8] sm:$0xff]  ;;  %v413_v25 = vld [vmem:[%s1506_s5 + $0x1d0] sm:$0xff] }
  0x23   :  { %v144_v3 = vld.sshfl [vmem:[#allocation1] sm:$0xff pattern:$0x75316420]  ;;  %v145_v4 = vld.sshfl [vmem:[#allocation1 + $0x8] sm:$0xff pattern:$0x75316420] }
  0x24   :  { %818 = vmatpush.msk.msra.mxu0 %vm152_vm0, %v144_v3  ;;  %820 = vmatpush.msk.msra.mxu1 %vm152_vm0, %v145_v4  ;;  %v146_v5 = vld.sshfl [vmem:[#allocation1 + $0x10] sm:$0xff pattern:$0x75316420]  ;;  %v147_v6 = vld.sshfl [vmem:[#allocation1 + $0x18] sm:$0xff pattern:$0x75316420] }
  0x25   :  { %822 = vmatpush.msk.msra.mxu2 %vm152_vm0, %v146_v5  ;;  %824 = vmatpush.msk.msra.mxu3 %vm152_vm0, %v147_v6  ;;  %v382_v26 = vld [vmem:[%s1506_s5 + $0xd8] sm:$0xff]  ;;  %v379_v28 = vld [vmem:[%s1506_s5 + $0xc0] sm:$0xff]  ;;  %v380_v30 = vld [vmem:[%s1506_s5 + $0xc8] sm:$0xff] }
  0x26   :  { %819 = vmatmul.msk.f32.vlgmr.msra.gmra.mxu0 %vm148_vm1, %v128_v2  ;;  %821 = vmatmul.msk.f32.vlgmr.msra.gmra.mxu1 %vm148_vm1, %v128_v2  ;;  %v414_v27 = vld [vmem:[%s1506_s5 + $0x1d8] sm:$0xff]  ;;  %v411_v29 = vld [vmem:[%s1506_s5 + $0x1c0] sm:$0xff]  ;;  %v412_v31 = vld [vmem:[%s1506_s5 + $0x1c8] sm:$0xff] }
  0x27   :  { %823 = vmatmul.msk.f32.vlgmr.msra.gmra.mxu2 %vm148_vm1, %v128_v2  ;;  %825 = vmatmul.msk.f32.vlgmr.msra.gmra.mxu3 %vm148_vm1, %v128_v2  ;;  %v377_v32 = vld [vmem:[%s1506_s5 + $0xb0] sm:$0xff]  ;;  %v378_v34 = vld [vmem:[%s1506_s5 + $0xb8] sm:$0xff]  ;;  %v375_v36 = vld [vmem:[%s1506_s5 + $0xa0] sm:$0xff] }
  0x28   :  { %826 = vmatpush.msk.msrb.mxu0 %vm152_vm0, %v133_v7  ;;  %828 = vmatpush.msk.msrb.mxu1 %vm152_vm0, %v134_v8  ;;  %v409_v33 = vld [vmem:[%s1506_s5 + $0x1b0] sm:$0xff]  ;;  %v410_v35 = vld [vmem:[%s1506_s5 + $0x1b8] sm:$0xff]  ;;  %v407_v37 = vld [vmem:[%s1506_s5 + $0x1a0] sm:$0xff] }
  0x29   :  { %830 = vmatpush.msk.msrb.mxu2 %vm152_vm0, %v135_v9  ;;  %832 = vmatpush.msk.msrb.mxu3 %vm152_vm0, %v136_v10  ;;  %v376_v38 = vld [vmem:[%s1506_s5 + $0xa8] sm:$0xff]  ;;  %v373_v40 = vld [vmem:[%s1506_s5 + $0x90] sm:$0xff]  ;;  %v374_v42 = vld [vmem:[%s1506_s5 + $0x98] sm:$0xff] }
  0x2a   :  { %272 = vmatpush.msrb.mxu0 %v129_v11  ;;  %292 = vmatpush.msrb.mxu1 %v130_v12  ;;  %v408_v39 = vld [vmem:[%s1506_s5 + $0x1a8] sm:$0xff]  ;;  %v405_v41 = vld [vmem:[%s1506_s5 + $0x190] sm:$0xff]  ;;  %v406_v43 = vld [vmem:[%s1506_s5 + $0x198] sm:$0xff] }
  0x2b   :  { %312 = vmatpush.msrb.mxu2 %v131_v13  ;;  %332 = vmatpush.msrb.mxu3 %v132_v14  ;;  %v371_v44 = vld [vmem:[%s1506_s5 + $0x80] sm:$0xff]  ;;  %v372_v46 = vld [vmem:[%s1506_s5 + $0x88] sm:$0xff]  ;;  %v369_v48 = vld [vmem:[%s1506_s5 + $0x70] sm:$0xff] }
  0x2c   :  { %425 = vmatpush.msra.mxu0 %v385_v15  ;;  %445 = vmatpush.msra.mxu1 %v417_v16  ;;  %v403_v45 = vld [vmem:[%s1506_s5 + $0x180] sm:$0xff]  ;;  %v404_v47 = vld [vmem:[%s1506_s5 + $0x188] sm:$0xff]  ;;  %v401_v49 = vld [vmem:[%s1506_s5 + $0x170] sm:$0xff] }
  0x2d   :  { %465 = vmatpush.msra.mxu2 %v386_v17  ;;  %485 = vmatpush.msra.mxu3 %v418_v18  ;;  %v370_v50 = vld [vmem:[%s1506_s5 + $0x78] sm:$0xff]  ;;  %v367_v52 = vld [vmem:[%s1506_s5 + $0x60] sm:$0xff]  ;;  %v368_v54 = vld [vmem:[%s1506_s5 + $0x68] sm:$0xff] }
  0x2e   :  { %827 = vmatmul.msk.f32.vlgmr.msrb.gmra.mxu0 %vm241_vm2, %v127_v19  ;;  %829 = vmatmul.msk.f32.vlgmr.msrb.gmra.mxu1 %vm241_vm2, %v127_v19  ;;  %v402_v51 = vld [vmem:[%s1506_s5 + $0x178] sm:$0xff]  ;;  %v399_v53 = vld [vmem:[%s1506_s5 + $0x160] sm:$0xff]  ;;  %v400_v55 = vld [vmem:[%s1506_s5 + $0x168] sm:$0xff] }
  0x2f   :  { %831 = vmatmul.msk.f32.vlgmr.msrb.gmra.mxu2 %vm241_vm2, %v127_v19  ;;  %833 = vmatmul.msk.f32.vlgmr.msrb.gmra.mxu3 %vm241_vm2, %v127_v19  ;;  %v365_v56 = vld [vmem:[%s1506_s5 + $0x50] sm:$0xff]  ;;  %v366_v58 = vld [vmem:[%s1506_s5 + $0x58] sm:$0xff]  ;;  %v363_v60 = vld [vmem:[%s1506_s5 + $0x40] sm:$0xff] }
  0x30   :  { %426 = vmatpush.msra.mxu0 %v383_v20  ;;  %446 = vmatpush.msra.mxu1 %v415_v21  ;;  %v397_v57 = vld [vmem:[%s1506_s5 + $0x150] sm:$0xff]  ;;  %v398_v59 = vld [vmem:[%s1506_s5 + $0x158] sm:$0xff]  ;;  %v395_v61 = vld [vmem:[%s1506_s5 + $0x140] sm:$0xff] }
  0x31   :  { %466 = vmatpush.msra.mxu2 %v384_v22  ;;  %486 = vmatpush.msra.mxu3 %v416_v23  ;;  %v364_v62 = vld [vmem:[%s1506_s5 + $0x48] sm:$0xff]  ;;  %v361_v0 = vld [vmem:[%s1506_s5 + $0x30] sm:$0xff]  ;;  %v362_v2 = vld [vmem:[%s1506_s5 + $0x38] sm:$0xff] }
  0x32   :  { %427 = vmatpush.msra.mxu0 %v381_v24  ;;  %447 = vmatpush.msra.mxu1 %v413_v25  ;;  %v396_v63 = vld [vmem:[%s1506_s5 + $0x148] sm:$0xff]  ;;  %v393_v1 = vld [vmem:[%s1506_s5 + $0x130] sm:$0xff]  ;;  %v394_v3 = vld [vmem:[%s1506_s5 + $0x138] sm:$0xff] }
  0x33   :  { %467 = vmatpush.msra.mxu2 %v382_v26  ;;  %487 = vmatpush.msra.mxu3 %v414_v27  ;;  %v359_v4 = vld [vmem:[%s1506_s5 + $0x20] sm:$0xff]  ;;  %v360_v6 = vld [vmem:[%s1506_s5 + $0x28] sm:$0xff]  ;;  %v357_v8 = vld [vmem:[%s1506_s5 + $0x10] sm:$0xff] }
  0x34   :  { %428 = vmatpush.msra.mxu0 %v379_v28  ;;  %448 = vmatpush.msra.mxu1 %v411_v29  ;;  %v391_v5 = vld [vmem:[%s1506_s5 + $0x120] sm:$0xff]  ;;  %v392_v7 = vld [vmem:[%s1506_s5 + $0x128] sm:$0xff]  ;;  %v389_v9 = vld [vmem:[%s1506_s5 + $0x110] sm:$0xff] }
  0x35   :  { %468 = vmatpush.msra.mxu2 %v380_v30  ;;  %488 = vmatpush.msra.mxu3 %v412_v31  ;;  %v358_v10 = vld [vmem:[%s1506_s5 + $0x18] sm:$0xff]  ;;  %v355_v12 = vld [vmem:[%s1506_s5] sm:$0xff]  ;;  %v356_v14 = vld [vmem:[%s1506_s5 + $0x8] sm:$0xff] }
  0x36   :  { %429 = vmatpush.msra.mxu0 %v377_v32  ;;  %449 = vmatpush.msra.mxu1 %v409_v33  ;;  %v390_v11 = vld [vmem:[%s1506_s5 + $0x118] sm:$0xff]  ;;  %v387_v13 = vld [vmem:[%s1506_s5 + $0x100] sm:$0xff]  ;;  %v388_v15 = vld [vmem:[%s1506_s5 + $0x108] sm:$0xff] }
  0x37   :  { %469 = vmatpush.msra.mxu2 %v378_v34  ;;  %489 = vmatpush.msra.mxu3 %v410_v35  ;;  %v537_v16 = vld [vmem:[#allocation7 + $0xf0] sm:$0xff]  ;;  %v538_v18 = vld [vmem:[#allocation7 + $0xf8] sm:$0xff]  ;;  %v535_v20 = vld [vmem:[#allocation7 + $0xe0] sm:$0xff] }
  0x38   :  { %430 = vmatpush.msra.mxu0 %v375_v36  ;;  %450 = vmatpush.msra.mxu1 %v407_v37  ;;  %v569_v17 = vld [vmem:[#allocation7 + $0x1f0] sm:$0xff]  ;;  %v570_v19 = vld [vmem:[#allocation7 + $0x1f8] sm:$0xff]  ;;  %v567_v21 = vld [vmem:[#allocation7 + $0x1e0] sm:$0xff] }
  0x39   :  { %470 = vmatpush.msra.mxu2 %v376_v38  ;;  %490 = vmatpush.msra.mxu3 %v408_v39  ;;  %v536_v22 = vld [vmem:[#allocation7 + $0xe8] sm:$0xff]  ;;  %v533_v24 = vld [vmem:[#allocation7 + $0xd0] sm:$0xff]  ;;  %v534_v26 = vld [vmem:[#allocation7 + $0xd8] sm:$0xff] }
  0x3a   :  { %431 = vmatpush.msra.mxu0 %v373_v40  ;;  %451 = vmatpush.msra.mxu1 %v405_v41  ;;  %v568_v23 = vld [vmem:[#allocation7 + $0x1e8] sm:$0xff]  ;;  %v565_v25 = vld [vmem:[#allocation7 + $0x1d0] sm:$0xff]  ;;  %v566_v27 = vld [vmem:[#allocation7 + $0x1d8] sm:$0xff] }
  0x3b   :  { %471 = vmatpush.msra.mxu2 %v374_v42  ;;  %491 = vmatpush.msra.mxu3 %v406_v43  ;;  %v531_v28 = vld [vmem:[#allocation7 + $0xc0] sm:$0xff]  ;;  %v532_v30 = vld [vmem:[#allocation7 + $0xc8] sm:$0xff]  ;;  %v529_v32 = vld [vmem:[#allocation7 + $0xb0] sm:$0xff] }
  0x3c   :  { %432 = vmatpush.msra.mxu0 %v371_v44  ;;  %452 = vmatpush.msra.mxu1 %v403_v45  ;;  %v563_v29 = vld [vmem:[#allocation7 + $0x1c0] sm:$0xff]  ;;  %v564_v31 = vld [vmem:[#allocation7 + $0x1c8] sm:$0xff]  ;;  %v561_v33 = vld [vmem:[#allocation7 + $0x1b0] sm:$0xff] }
  0x3d   :  { %472 = vmatpush.msra.mxu2 %v372_v46  ;;  %492 = vmatpush.msra.mxu3 %v404_v47  ;;  %v530_v34 = vld [vmem:[#allocation7 + $0xb8] sm:$0xff]  ;;  %v527_v36 = vld [vmem:[#allocation7 + $0xa0] sm:$0xff]  ;;  %v528_v38 = vld [vmem:[#allocation7 + $0xa8] sm:$0xff] }
  0x3e   :  { %433 = vmatpush.msra.mxu0 %v369_v48  ;;  %453 = vmatpush.msra.mxu1 %v401_v49  ;;  %v562_v35 = vld [vmem:[#allocation7 + $0x1b8] sm:$0xff]  ;;  %v559_v37 = vld [vmem:[#allocation7 + $0x1a0] sm:$0xff]  ;;  %v560_v39 = vld [vmem:[#allocation7 + $0x1a8] sm:$0xff] }
  0x3f   :  { %473 = vmatpush.msra.mxu2 %v370_v50  ;;  %493 = vmatpush.msra.mxu3 %v402_v51  ;;  %v525_v40 = vld [vmem:[#allocation7 + $0x90] sm:$0xff]  ;;  %v526_v42 = vld [vmem:[#allocation7 + $0x98] sm:$0xff]  ;;  %v523_v44 = vld [vmem:[#allocation7 + $0x80] sm:$0xff] }
  0x40   :  { %434 = vmatpush.msra.mxu0 %v367_v52  ;;  %454 = vmatpush.msra.mxu1 %v399_v53  ;;  %v557_v41 = vld [vmem:[#allocation7 + $0x190] sm:$0xff]  ;;  %v558_v43 = vld [vmem:[#allocation7 + $0x198] sm:$0xff]  ;;  %v555_v45 = vld [vmem:[#allocation7 + $0x180] sm:$0xff] }
  0x41   :  { %474 = vmatpush.msra.mxu2 %v368_v54  ;;  %494 = vmatpush.msra.mxu3 %v400_v55  ;;  %v524_v46 = vld [vmem:[#allocation7 + $0x88] sm:$0xff]  ;;  %v521_v48 = vld [vmem:[#allocation7 + $0x70] sm:$0xff]  ;;  %v522_v50 = vld [vmem:[#allocation7 + $0x78] sm:$0xff] }
  0x42   :  { %435 = vmatpush.msra.mxu0 %v365_v56  ;;  %455 = vmatpush.msra.mxu1 %v397_v57  ;;  %v556_v47 = vld [vmem:[#allocation7 + $0x188] sm:$0xff]  ;;  %v553_v49 = vld [vmem:[#allocation7 + $0x170] sm:$0xff]  ;;  %v554_v51 = vld [vmem:[#allocation7 + $0x178] sm:$0xff] }
  0x43   :  { %475 = vmatpush.msra.mxu2 %v366_v58  ;;  %495 = vmatpush.msra.mxu3 %v398_v59  ;;  %v519_v52 = vld [vmem:[#allocation7 + $0x60] sm:$0xff]  ;;  %v520_v54 = vld [vmem:[#allocation7 + $0x68] sm:$0xff]  ;;  %v517_v56 = vld [vmem:[#allocation7 + $0x50] sm:$0xff] }
  0x44   :  { %436 = vmatpush.msra.mxu0 %v363_v60  ;;  %456 = vmatpush.msra.mxu1 %v395_v61  ;;  %v551_v53 = vld [vmem:[#allocation7 + $0x160] sm:$0xff]  ;;  %v552_v55 = vld [vmem:[#allocation7 + $0x168] sm:$0xff]  ;;  %v549_v57 = vld [vmem:[#allocation7 + $0x150] sm:$0xff] }
  0x45   :  { %476 = vmatpush.msra.mxu2 %v364_v62  ;;  %496 = vmatpush.msra.mxu3 %v396_v63  ;;  %v518_v58 = vld [vmem:[#allocation7 + $0x58] sm:$0xff]  ;;  %v515_v60 = vld [vmem:[#allocation7 + $0x40] sm:$0xff]  ;;  %v516_v62 = vld [vmem:[#allocation7 + $0x48] sm:$0xff] }
  0x46   :  { %437 = vmatpush.msra.mxu0 %v361_v0  ;;  %457 = vmatpush.msra.mxu1 %v393_v1  ;;  %v550_v59 = vld [vmem:[#allocation7 + $0x158] sm:$0xff]  ;;  %v547_v61 = vld [vmem:[#allocation7 + $0x140] sm:$0xff]  ;;  %v548_v63 = vld [vmem:[#allocation7 + $0x148] sm:$0xff] }
  0x47   :  { %477 = vmatpush.msra.mxu2 %v362_v2  ;;  %497 = vmatpush.msra.mxu3 %v394_v3  ;;  %v513_v0 = vld [vmem:[#allocation7 + $0x30] sm:$0xff]  ;;  %v514_v2 = vld [vmem:[#allocation7 + $0x38] sm:$0xff] }
  0x48   :  { %438 = vmatpush.msra.mxu0 %v359_v4  ;;  %458 = vmatpush.msra.mxu1 %v391_v5  ;;  %v545_v1 = vld [vmem:[#allocation7 + $0x130] sm:$0xff]  ;;  %v546_v3 = vld [vmem:[#allocation7 + $0x138] sm:$0xff]  ;;  %v511_v4 = vld [vmem:[#allocation7 + $0x20] sm:$0xff] }
  0x49   :  { %478 = vmatpush.msra.mxu2 %v360_v6  ;;  %498 = vmatpush.msra.mxu3 %v392_v7  ;;  %v543_v5 = vld [vmem:[#allocation7 + $0x120] sm:$0xff]  ;;  %v512_v6 = vld [vmem:[#allocation7 + $0x28] sm:$0xff] }
  0x4a   :  { %439 = vmatpush.msra.mxu0 %v357_v8  ;;  %459 = vmatpush.msra.mxu1 %v389_v9  ;;  %v544_v7 = vld [vmem:[#allocation7 + $0x128] sm:$0xff]  ;;  %v509_v8 = vld [vmem:[#allocation7 + $0x10] sm:$0xff] }
  0x4b   :  { %479 = vmatpush.msra.mxu2 %v358_v10  ;;  %499 = vmatpush.msra.mxu3 %v390_v11  ;;  %v541_v9 = vld [vmem:[#allocation7 + $0x110] sm:$0xff]  ;;  %v510_v10 = vld [vmem:[#allocation7 + $0x18] sm:$0xff] }
  0x4c   :  { %440 = vmatpush.msra.mxu0 %v355_v12  ;;  %460 = vmatpush.msra.mxu1 %v387_v13  ;;  %v542_v11 = vld [vmem:[#allocation7 + $0x118] sm:$0xff]  ;;  %v507_v12 = vld [vmem:[#allocation7] sm:$0xff] }
  0x4d   :  { %480 = vmatpush.msra.mxu2 %v356_v14  ;;  %500 = vmatpush.msra.mxu3 %v388_v15  ;;  %v539_v13 = vld [vmem:[#allocation7 + $0x100] sm:$0xff]  ;;  %v508_v14 = vld [vmem:[#allocation7 + $0x8] sm:$0xff] }
  0x4e   :  { %577 = vmatpush.msrb.mxu0 %v537_v16  ;;  %597 = vmatpush.msrb.mxu1 %v569_v17  ;;  %v540_v15 = vld [vmem:[#allocation7 + $0x108] sm:$0xff] }
  0x4f   :  { %617 = vmatpush.msrb.mxu2 %v538_v18  ;;  %637 = vmatpush.msrb.mxu3 %v570_v19  ;;  %v337_v18 = vld [vmem:[#allocation4] sm:$0xf] }
  0x50   :  { %578 = vmatpush.msrb.mxu0 %v535_v20  ;;  %598 = vmatpush.msrb.mxu1 %v567_v21  ;;  %v339_v21 = vperm.slane %v337_v18, 0 }
  0x51   :  { %618 = vmatpush.msrb.mxu2 %v536_v22  ;;  %638 = vmatpush.msrb.mxu3 %v568_v23  ;;  %v340_v22 = vperm.slane %v337_v18, 1 }
  0x52   :  { %579 = vmatpush.msrb.mxu0 %v533_v24  ;;  %599 = vmatpush.msrb.mxu1 %v565_v25 }
  0x53   :  { %619 = vmatpush.msrb.mxu2 %v534_v26  ;;  %639 = vmatpush.msrb.mxu3 %v566_v27 }
  0x54   :  { %580 = vmatpush.msrb.mxu0 %v531_v28  ;;  %600 = vmatpush.msrb.mxu1 %v563_v29 }
  0x55   :  { %620 = vmatpush.msrb.mxu2 %v532_v30  ;;  %640 = vmatpush.msrb.mxu3 %v564_v31  ;;  %v341_v31 = vperm.slane %v337_v18, 2 }
  0x56   :  { %581 = vmatpush.msrb.mxu0 %v529_v32  ;;  %601 = vmatpush.msrb.mxu1 %v561_v33  ;;  %v342_v32 = vperm.slane %v337_v18, 3  ;;  %v674_v33 = vld [vmem:[%s1510_s9 + $0x78] sm:$0xff]  ;;  %v680_v18 = vld [vmem:[%s1510_s9 + $0xa8] sm:$0xff] }
  0x57   :  { %621 = vmatpush.msrb.mxu2 %v530_v34  ;;  %641 = vmatpush.msrb.mxu3 %v562_v35  ;;  %v690_v34 = vld [vmem:[%s1510_s9 + $0xf8] sm:$0xff] }
  0x58   :  { %582 = vmatpush.msrb.mxu0 %v527_v36  ;;  %602 = vmatpush.msrb.mxu1 %v559_v37  ;;  %v706_v37 = vld [vmem:[%s1511_s10 + $0x78] sm:$0xff] }
  0x59   :  { %622 = vmatpush.msrb.mxu2 %v528_v38  ;;  %642 = vmatpush.msrb.mxu3 %v560_v39  ;;  %v722_v38 = vld [vmem:[%s1511_s10 + $0xf8] sm:$0xff] }
  0x5a   :  { %583 = vmatpush.msrb.mxu0 %v525_v40  ;;  %603 = vmatpush.msrb.mxu1 %v557_v41  ;;  %v673_v41 = vld [vmem:[%s1510_s9 + $0x70] sm:$0xff] }
  0x5b   :  { %623 = vmatpush.msrb.mxu2 %v526_v42  ;;  %643 = vmatpush.msrb.mxu3 %v558_v43  ;;  %v689_v42 = vld [vmem:[%s1510_s9 + $0xf0] sm:$0xff] }
  0x5c   :  { %584 = vmatpush.msrb.mxu0 %v523_v44  ;;  %604 = vmatpush.msrb.mxu1 %v555_v45  ;;  %v705_v43 = vld [vmem:[%s1511_s10 + $0x70] sm:$0xff] }
  0x5d   :  { %624 = vmatpush.msrb.mxu2 %v524_v46  ;;  %644 = vmatpush.msrb.mxu3 %v556_v47  ;;  %v721_v44 = vld [vmem:[%s1511_s10 + $0xf0] sm:$0xff]  ;;  %v672_v47 = vld [vmem:[%s1510_s9 + $0x68] sm:$0xff] }
  0x5e   :  { %585 = vmatpush.msrb.mxu0 %v521_v48  ;;  %605 = vmatpush.msrb.mxu1 %v553_v49  ;;  %v688_v48 = vld [vmem:[%s1510_s9 + $0xe8] sm:$0xff] }
  0x5f   :  { %625 = vmatpush.msrb.mxu2 %v522_v50  ;;  %645 = vmatpush.msrb.mxu3 %v554_v51  ;;  %v704_v49 = vld [vmem:[%s1511_s10 + $0x68] sm:$0xff] }
  0x60   :  { %586 = vmatpush.msrb.mxu0 %v519_v52  ;;  %606 = vmatpush.msrb.mxu1 %v551_v53  ;;  %v720_v50 = vld [vmem:[%s1511_s10 + $0xe8] sm:$0xff]  ;;  %v671_v53 = vld [vmem:[%s1510_s9 + $0x60] sm:$0xff] }
  0x61   :  { %626 = vmatpush.msrb.mxu2 %v520_v54  ;;  %646 = vmatpush.msrb.mxu3 %v552_v55  ;;  %v687_v54 = vld [vmem:[%s1510_s9 + $0xe0] sm:$0xff] }
  0x62   :  { %587 = vmatpush.msrb.mxu0 %v517_v56  ;;  %607 = vmatpush.msrb.mxu1 %v549_v57  ;;  %v703_v55 = vld [vmem:[%s1511_s10 + $0x60] sm:$0xff]  ;;  %v670_v57 = vld [vmem:[%s1510_s9 + $0x58] sm:$0xff] }
  0x63   :  { %627 = vmatpush.msrb.mxu2 %v518_v58  ;;  %647 = vmatpush.msrb.mxu3 %v550_v59  ;;  %v719_v56 = vld [vmem:[%s1511_s10 + $0xe0] sm:$0xff]  ;;  %v686_v58 = vld [vmem:[%s1510_s9 + $0xd8] sm:$0xff] }
  0x64   :  { %588 = vmatpush.msrb.mxu0 %v515_v60  ;;  %608 = vmatpush.msrb.mxu1 %v547_v61  ;;  %v702_v59 = vld [vmem:[%s1511_s10 + $0x58] sm:$0xff]  ;;  %v669_v61 = vld [vmem:[%s1510_s9 + $0x50] sm:$0xff] }
  0x65   :  { %628 = vmatpush.msrb.mxu2 %v516_v62  ;;  %648 = vmatpush.msrb.mxu3 %v548_v63  ;;  %v718_v60 = vld [vmem:[%s1511_s10 + $0xd8] sm:$0xff]  ;;  %v685_v62 = vld [vmem:[%s1510_s9 + $0xd0] sm:$0xff] }
  0x66   :  { %589 = vmatpush.msrb.mxu0 %v513_v0  ;;  %609 = vmatpush.msrb.mxu1 %v545_v1  ;;  %v701_v63 = vld [vmem:[%s1511_s10 + $0x50] sm:$0xff]  ;;  %v668_v0 = vld [vmem:[%s1510_s9 + $0x48] sm:$0xff] }
  0x67   :  { %629 = vmatpush.msrb.mxu2 %v514_v2  ;;  %649 = vmatpush.msrb.mxu3 %v546_v3  ;;  %v684_v1 = vld [vmem:[%s1510_s9 + $0xc8] sm:$0xff]  ;;  %v667_v3 = vld [vmem:[%s1510_s9 + $0x40] sm:$0xff] }
  0x68   :  { %590 = vmatpush.msrb.mxu0 %v511_v4  ;;  %610 = vmatpush.msrb.mxu1 %v543_v5  ;;  %v700_v2 = vld [vmem:[%s1511_s10 + $0x48] sm:$0xff]  ;;  %v683_v4 = vld [vmem:[%s1510_s9 + $0xc0] sm:$0xff] }
  0x69   :  { %630 = vmatpush.msrb.mxu2 %v512_v6  ;;  %650 = vmatpush.msrb.mxu3 %v544_v7  ;;  %v699_v5 = vld [vmem:[%s1511_s10 + $0x40] sm:$0xff]  ;;  %v666_v6 = vld [vmem:[%s1510_s9 + $0x38] sm:$0xff] }
  0x6a   :  { %591 = vmatpush.msrb.mxu0 %v509_v8  ;;  %611 = vmatpush.msrb.mxu1 %v541_v9  ;;  %v682_v7 = vld [vmem:[%s1510_s9 + $0xb8] sm:$0xff]  ;;  %v665_v8 = vld [vmem:[%s1510_s9 + $0x30] sm:$0xff]  ;;  %v664_v9 = vld [vmem:[%s1510_s9 + $0x28] sm:$0xff] }
  0x6b   :  { %631 = vmatpush.msrb.mxu2 %v510_v10  ;;  %651 = vmatpush.msrb.mxu3 %v542_v11  ;;  %v663_v10 = vld [vmem:[%s1510_s9 + $0x20] sm:$0xff]  ;;  %v698_v11 = vld [vmem:[%s1511_s10 + $0x38] sm:$0xff] }
  0x6c   :  { %592 = vmatpush.msrb.mxu0 %v507_v12  ;;  %612 = vmatpush.msrb.mxu1 %v539_v13  ;;  %v717_v12 = vld [vmem:[%s1511_s10 + $0xd0] sm:$0xff]  ;;  %v662_v13 = vld [vmem:[%s1510_s9 + $0x18] sm:$0xff] }
  0x6d   :  { %632 = vmatpush.msrb.mxu2 %v508_v14  ;;  %652 = vmatpush.msrb.mxu3 %v540_v15  ;;  %v681_v14 = vld [vmem:[%s1510_s9 + $0xb0] sm:$0xff] }
  0x6e   :  { %v697_v15 = vld [vmem:[%s1511_s10 + $0x30] sm:$0xff] }
  0xa3   :  { %v178_v16 = vpop.f32.mrf.mxu0  ;;  %v198_v17 = vpop.f32.mrf.mxu1 }
  0xaa   :  { %v218_v19 = vpop.f32.mrf.mxu2  ;;  %v238_v20 = vpop.f32.mrf.mxu3 }
  0xab   :  { %v274_v23 = vpop.f32.mrf.mxu0  ;;  %v294_v24 = vpop.f32.mrf.mxu1 }
  0xac   :  { %v275_v25 = vadd.f32 %v274_v23, %v178_v16  ;;  %v295_v26 = vadd.f32 %v294_v24, %v198_v17  ;;  %v716_v16 = vld [vmem:[%s1511_s10 + $0xc8] sm:$0xff]  ;;  %v661_v17 = vld [vmem:[%s1510_s9 + $0x10] sm:$0xff]  ;;  %v695_v23 = vld [vmem:[%s1511_s10 + $0x20] sm:$0xff] }
  0xad   :  { %v714_v24 = vld [vmem:[%s1511_s10 + $0xb8] sm:$0xff] }
  0xae   :  { %v347_v27 = vadd.f32 %v339_v21, %v275_v25  ;;  %v348_v28 = vadd.f32 %v340_v22, %v295_v26  ;;  %v660_v21 = vld [vmem:[%s1510_s9 + $0x8] sm:$0xff]  ;;  %v679_v22 = vld [vmem:[%s1510_s9 + $0xa0] sm:$0xff]  ;;  %v678_v26 = vld [vmem:[%s1510_s9 + $0x98] sm:$0xff] }
  0xaf   :  { %v659_v25 = vld [vmem:[%s1510_s9] sm:$0xff] }
  0xb0   :  { %v351_v29 = vmax.f32 %v347_v27, 0.0  ;;  %v352_v30 = vmax.f32 %v348_v28, 0.0  ;;  %v694_v27 = vld [vmem:[%s1511_s10 + $0x18] sm:$0xff]  ;;  %v713_v28 = vld [vmem:[%s1511_s10 + $0xb0] sm:$0xff] }
  0xb2   :  { %v314_v35 = vpop.f32.mrf.mxu2  ;;  %v334_v36 = vpop.f32.mrf.mxu3  ;;  %441 = vmatmul.f32.vlgmr.msra.gmra.mxu0 %v351_v29  ;;  %461 = vmatmul.f32.vlgmr.msra.gmra.mxu1 %v352_v30 }
  0xb3   :  { %v315_v39 = vadd.f32 %v314_v35, %v218_v19  ;;  %v335_v40 = vadd.f32 %v334_v36, %v238_v20  ;;  %481 = vmatmul.f32.vlgmr.msra.gmra.mxu2 %v351_v29  ;;  %501 = vmatmul.f32.vlgmr.msra.gmra.mxu3 %v352_v30  ;;  %v696_v19 = vld [vmem:[%s1511_s10 + $0x28] sm:$0xff]  ;;  %v715_v20 = vld [vmem:[%s1511_s10 + $0xc0] sm:$0xff]  ;;  %v677_v29 = vld [vmem:[%s1510_s9 + $0x90] sm:$0xff] }
  0xb4   :  { %763 = vmatpush.msra.mxu2 %v674_v33  ;;  %783 = vmatpush.msra.mxu3 %v690_v34  ;;  %v693_v30 = vld [vmem:[%s1511_s10 + $0x10] sm:$0xff]  ;;  %v692_v33 = vld [vmem:[%s1511_s10 + $0x8] sm:$0xff]  ;;  %v711_v34 = vld [vmem:[%s1511_s10 + $0xa0] sm:$0xff] }
  0xb5   :  { %v349_v45 = vadd.f32 %v341_v31, %v315_v39  ;;  %v350_v46 = vadd.f32 %v342_v32, %v335_v40  ;;  %723 = vmatpush.msra.mxu0 %v706_v37  ;;  %743 = vmatpush.msra.mxu1 %v722_v38  ;;  %v712_v31 = vld [vmem:[%s1511_s10 + $0xa8] sm:$0xff]  ;;  %v675_v35 = vld [vmem:[%s1510_s9 + $0x80] sm:$0xff]  ;;  %v710_v37 = vld [vmem:[%s1511_s10 + $0x98] sm:$0xff] }
  0xb6   :  { %764 = vmatpush.msra.mxu2 %v673_v41  ;;  %784 = vmatpush.msra.mxu3 %v689_v42  ;;  %v676_v32 = vld [vmem:[%s1510_s9 + $0x88] sm:$0xff]  ;;  %v691_v36 = vld [vmem:[%s1511_s10] sm:$0xff]  ;;  %v709_v38 = vld [vmem:[%s1511_s10 + $0x90] sm:$0xff] }
  0xb7   :  { %724 = vmatpush.msra.mxu0 %v705_v43  ;;  %744 = vmatpush.msra.mxu1 %v721_v44  ;;  %v353_v51 = vmax.f32 %v349_v45, 0.0  ;;  %v354_v52 = vmax.f32 %v350_v46, 0.0  ;;  %v708_v39 = vld [vmem:[%s1511_s10 + $0x88] sm:$0xff]  ;;  %v707_v40 = vld [vmem:[%s1511_s10 + $0x80] sm:$0xff] }
  0xb8   :  { %765 = vmatpush.msra.mxu2 %v672_v47  ;;  %785 = vmatpush.msra.mxu3 %v688_v48  ;;  %v419_v41 = vld [vmem:[#allocation6] sm:$0x3]  ;;  %v571_v46 = vld [vmem:[#allocation9] sm:$0x3] }
  0xb9   :  { %725 = vmatpush.msra.mxu0 %v704_v49  ;;  %745 = vmatpush.msra.mxu1 %v720_v50  ;;  %v421_v42 = vperm.slane %v419_v41, 0  ;;  %v422_v48 = vperm.slane %v419_v41, 1  ;;  %v573_v50 = vperm.slane %v571_v46, 0 }
  0xba   :  { %593 = vmatmul.f32.vlgmr.msrb.gmra.mxu0 %v353_v51  ;;  %613 = vmatmul.f32.vlgmr.msrb.gmra.mxu1 %v354_v52 }
  0xbb   :  { %633 = vmatmul.f32.vlgmr.msrb.gmra.mxu2 %v353_v51  ;;  %653 = vmatmul.f32.vlgmr.msrb.gmra.mxu3 %v354_v52 }
  0xbc   :  { %766 = vmatpush.msra.mxu2 %v671_v53  ;;  %786 = vmatpush.msra.mxu3 %v687_v54 }
  0xbd   :  { %726 = vmatpush.msra.mxu0 %v703_v55  ;;  %746 = vmatpush.msra.mxu1 %v719_v56 }
  0xbe   :  { %767 = vmatpush.msra.mxu2 %v670_v57  ;;  %787 = vmatpush.msra.mxu3 %v686_v58 }
  0xbf   :  { %727 = vmatpush.msra.mxu0 %v702_v59  ;;  %747 = vmatpush.msra.mxu1 %v718_v60  ;;  %v574_v60 = vperm.slane %v571_v46, 1 }
  0xc0   :  { %768 = vmatpush.msra.mxu2 %v669_v61  ;;  %788 = vmatpush.msra.mxu3 %v685_v62 }
  0xc1   :  { %728 = vmatpush.msra.mxu0 %v701_v63  ;;  %748 = vmatpush.msra.mxu1 %v717_v12 }
  0xc2   :  { %769 = vmatpush.msra.mxu2 %v668_v0  ;;  %789 = vmatpush.msra.mxu3 %v684_v1 }
  0xc3   :  { %729 = vmatpush.msra.mxu0 %v700_v2  ;;  %749 = vmatpush.msra.mxu1 %v716_v16 }
  0xc4   :  { %770 = vmatpush.msra.mxu2 %v667_v3  ;;  %790 = vmatpush.msra.mxu3 %v683_v4 }
  0xc5   :  { %730 = vmatpush.msra.mxu0 %v699_v5  ;;  %750 = vmatpush.msra.mxu1 %v715_v20 }
  0xc6   :  { %771 = vmatpush.msra.mxu2 %v666_v6  ;;  %791 = vmatpush.msra.mxu3 %v682_v7 }
  0xc7   :  { %731 = vmatpush.msra.mxu0 %v698_v11  ;;  %751 = vmatpush.msra.mxu1 %v714_v24 }
  0xc8   :  { %772 = vmatpush.msra.mxu2 %v665_v8  ;;  %792 = vmatpush.msra.mxu3 %v681_v14  ;;  %v844_v8 = vld [vmem:[#allocation10] ss:$0 sm:$0xff] }
  0xc9   :  { %732 = vmatpush.msra.mxu0 %v697_v15  ;;  %752 = vmatpush.msra.mxu1 %v713_v28 }
  0xca   :  { %773 = vmatpush.msra.mxu2 %v664_v9  ;;  %793 = vmatpush.msra.mxu3 %v680_v18 }
  0xcb   :  { %733 = vmatpush.msra.mxu0 %v696_v19  ;;  %753 = vmatpush.msra.mxu1 %v712_v31 }
  0xcc   :  { %774 = vmatpush.msra.mxu2 %v663_v10  ;;  %794 = vmatpush.msra.mxu3 %v679_v22 }
  0xcd   :  { %734 = vmatpush.msra.mxu0 %v695_v23  ;;  %754 = vmatpush.msra.mxu1 %v711_v34 }
  0xce   :  { %775 = vmatpush.msra.mxu2 %v662_v13  ;;  %795 = vmatpush.msra.mxu3 %v678_v26 }
  0xcf   :  { %735 = vmatpush.msra.mxu0 %v694_v27  ;;  %755 = vmatpush.msra.mxu1 %v710_v37 }
  0xd0   :  { %776 = vmatpush.msra.mxu2 %v661_v17  ;;  %796 = vmatpush.msra.mxu3 %v677_v29 }
  0xd1   :  { %736 = vmatpush.msra.mxu0 %v693_v30  ;;  %756 = vmatpush.msra.mxu1 %v709_v38 }
  0xd2   :  { %777 = vmatpush.msra.mxu2 %v660_v21  ;;  %797 = vmatpush.msra.mxu3 %v676_v32 }
  0xd3   :  { %737 = vmatpush.msra.mxu0 %v692_v33  ;;  %757 = vmatpush.msra.mxu1 %v708_v39 }
  0xd4   :  { %778 = vmatpush.msra.mxu2 %v659_v25  ;;  %798 = vmatpush.msra.mxu3 %v675_v35 }
  0xd5   :  { %738 = vmatpush.msra.mxu0 %v691_v36  ;;  %758 = vmatpush.msra.mxu1 %v707_v40 }
 0x12f   :  { %v442_v43 = vpop.f32.mrf.mxu0  ;;  %v462_v44 = vpop.f32.mrf.mxu1 }
 0x130   :  { %v443_v45 = vadd.f32 %v442_v43, %v421_v42 }
 0x132   :  { %v463_v47 = vadd.f32 %v462_v44, %v443_v45 }
 0x134   :  { %v505_v49 = vmax.f32 %v463_v47, 0.0 }
 0x136   :  { %v482_v51 = vpop.f32.mrf.mxu2  ;;  %v502_v52 = vpop.f32.mrf.mxu3  ;;  %779 = vmatmul.f32.vlgmr.msra.gmra.mxu2 %v505_v49 }
 0x137   :  { %v483_v53 = vadd.f32 %v482_v51, %v422_v48  ;;  %v594_v54 = vpop.f32.mrf.mxu0  ;;  %v614_v57 = vpop.f32.mrf.mxu1 }
 0x138   :  { %v595_v55 = vadd.f32 %v594_v54, %v573_v50 }
 0x139   :  { %v503_v56 = vadd.f32 %v502_v52, %v483_v53 }
 0x13a   :  { %v615_v58 = vadd.f32 %v614_v57, %v595_v55 }
 0x13b   :  { %v506_v59 = vmax.f32 %v503_v56, 0.0 }
 0x13c   :  { %v657_v61 = vmax.f32 %v615_v58, 0.0 }
 0x13d   :  { %799 = vmatmul.f32.vlgmr.msra.gmra.mxu3 %v506_v59 }
 0x13e   :  { %v634_v62 = vpop.f32.mrf.mxu2  ;;  %739 = vmatmul.f32.vlgmr.msra.gmra.mxu0 %v657_v61  ;;  %v654_v0 = vpop.f32.mrf.mxu3 }
 0x13f   :  { %v635_v63 = vadd.f32 %v634_v62, %v574_v60 }
 0x141   :  { %v655_v1 = vadd.f32 %v654_v0, %v635_v63 }
 0x143   :  { %v658_v2 = vmax.f32 %v655_v1, 0.0 }
 0x145   :  { %759 = vmatmul.f32.vlgmr.msra.gmra.mxu1 %v658_v2 }
 0x1b9   :  { %v780_v6 = vpop.f32.mrf.mxu2 }
 0x1bb   :  { %v740_v3 = vpop.f32.mrf.mxu0 }
 0x1c0   :  { %v800_v9 = vpop.f32.mrf.mxu3 }
 0x1c2   :  { %v760_v4 = vpop.f32.mrf.mxu1 }
 0x1c3   :  { %v761_v5 = vadd.f32 %v760_v4, %v740_v3 }
 0x1c5   :  { %v781_v7 = vadd.f32 %v780_v6, %v761_v5 }
 0x1c7   :  { %v801_v10 = vadd.f32 %v800_v9, %v781_v7 }
 0x1c9   :  { %v807_v11 = vadd.f32 %v844_v8, %v801_v10 }
 0x1cb   :  { %809 = vst.msk [vmem:[%s1513_s12] sm:$0xff] %vm808_vm3, %v807_v11 }
 0x1cc   :  { %814 = vsyncpa [#allocation3], 1 }
 0x1cd   :  { %815 = vsyncpa [#allocation5], 1 }
 0x1ce   :  { %816 = vsyncpa [#allocation8], 1 }
 0x1cf   :  { %817 = vsyncpa [#allocation11], 1 }

</bundles_post_ra>
